<compile_context>
chip_gen: v7x
topology: tpu7x:2x2x1
jax: 0.10.0
libtpu: 0.0.40
codegen_flags: <defaults>
</compile_context>

<pallas_src>
import math

import jax
import jax.numpy as jnp
from jax.experimental import pallas as pl
from jax.experimental.pallas import tpu as pltpu


def make_pe_table(n_classes: int, d_model: int) -> jax.Array:
    """Deterministic sinusoidal table, identical to the PyTorch __init__."""
    position = jnp.arange(n_classes, dtype=jnp.float32)[:, None]            # (C, 1)
    div_term = jnp.exp(
        jnp.arange(0, d_model, 2, dtype=jnp.float32) * (-math.log(10000.0) / d_model)
    )                                                                        # (D/2,)
    angles = position * div_term                                             # (C, D/2)
    pe = jnp.zeros((n_classes, d_model), dtype=jnp.float32)
    pe = pe.at[:, 0::2].set(jnp.sin(angles))
    pe = pe.at[:, 1::2].set(jnp.cos(angles))
    return pe


def _class_encoding_kernel(y_ref, x_ref, pe_ref, o_ref):
    # y_ref : (tm, fold)             int32  VMEM — class ids for the packed rows
    # x_ref : (tm, fold*d_model)     f32    VMEM — lane-dense activation tile
    # pe_ref: (fold*C, fold*d_model) f32    VMEM — block-diagonal pe table
    # o_ref : (tm, fold*d_model)            VMEM
    tm, fold = y_ref.shape
    n_classes = pe_ref.shape[0] // fold

    y = y_ref[...]                                                   # (tm, fold)
    cls_iota = jax.lax.broadcasted_iota(jnp.int32, (tm, n_classes), 1)

    # One-hot over classes for each of the `fold` sub-rows packed in a tile row.
    pieces = [
        (y[:, j:j + 1] == cls_iota).astype(jnp.float32)              # (tm, C)
        for j in range(fold)
    ]
    onehot = pieces[0] if fold == 1 else jnp.concatenate(pieces, axis=1)  # (tm, fold*C)

    # Gather == one MXU contraction (MXU is otherwise idle in this kernel).
    gathered = jnp.dot(onehot, pe_ref[...],
                       preferred_element_type=jnp.float32)           # (tm, fold*D)

    # Single vectorized add + single (lane-dense) store for the whole tile.
    o_ref[...] = (x_ref[...] + gathered).astype(o_ref.dtype)


def class_encoding_forward(x: jax.Array, y: jax.Array, pe: jax.Array,
                           *, rows_per_tile: int = 1024) -> jax.Array:
    """x: [seq, batch, d_model] float; y: [seq, batch] int; pe: [C, d_model] f32."""
    seq, batch, d_model = x.shape
    N = seq * batch

    # Lane-folding factor: pack `fold` rows into the 128-lane axis when possible.
    fold = 128 // d_model if (d_model < 128 and 128 % d_model == 0) else 1
    d_out = fold * d_model

    # Folded row tile: multiple of 8 sublanes, capped to the (padded) problem size.
    folded_rows = pl.cdiv(N, fold)
    tm = max(8, min(rows_per_tile // fold, ((folded_rows + 7) // 8) * 8))
    grid = pl.cdiv(folded_rows, tm)
    n_pad_rows = grid * tm * fold            # original rows incl. padding

    x_flat = x.reshape(N, d_model)
    y_flat = y.reshape(N).astype(jnp.int32)
    if n_pad_rows != N:                      # pad the ragged tail (sliced off below)
        x_flat = jnp.pad(x_flat, ((0, n_pad_rows - N), (0, 0)))
        y_flat = jnp.pad(y_flat, ((0, n_pad_rows - N),))

    x_in = x_flat.reshape(n_pad_rows // fold, d_out)    # lane-dense slab (free reshape)
    y_in = y_flat.reshape(n_pad_rows // fold, fold)

    # Block-diagonal pe so one contraction produces the folded (lane-dense) layout.
    pe = pe.astype(jnp.float32)
    pe_tbl = pe if fold == 1 else jnp.kron(jnp.eye(fold, dtype=pe.dtype), pe)

    out = pl.pallas_call(
        _class_encoding_kernel,
        out_shape=jax.ShapeDtypeStruct((n_pad_rows // fold, d_out), x.dtype),
        grid_spec=pltpu.PrefetchScalarGridSpec(
            num_scalar_prefetch=0,
            grid=(grid,),
            in_specs=[
                pl.BlockSpec((tm, fold), lambda i: (i, 0)),        # class ids
                pl.BlockSpec((tm, d_out), lambda i: (i, 0)),       # x tile
                # Small constant table: constant block index -> DMA'd once,
                # stays VMEM-resident across the whole grid.
                pl.BlockSpec(pe_tbl.shape, lambda i: (0, 0)),
            ],
            out_specs=pl.BlockSpec((tm, d_out), lambda i: (i, 0)),
        ),
        compiler_params=pltpu.CompilerParams(
            dimension_semantics=("parallel",)),                    # v7x: shard over both TCs
    )(y_in, x_in, pe_tbl)

    out = out.reshape(n_pad_rows, d_model)[:N]
    return out.reshape(seq, batch, d_model)


if __name__ == "__main__":
    # Small shapes consistent with the module: seq=8, batch=2, d_model=32, n_classes=128
    seq, batch, d_model, n_classes = 8, 2, 32, 128

    key = jax.random.PRNGKey(0)
    kx, ky = jax.random.split(key)
    x = jax.random.normal(kx, (seq, batch, d_model), dtype=jnp.float32)
    y = jax.random.randint(ky, (seq, batch), 0, n_classes, dtype=jnp.int32)

    pe = make_pe_table(n_classes, d_model)

    out = jax.block_until_ready(class_encoding_forward(x, y, pe))

    # Pure-JAX reference (eval-mode dropout == identity)
    ref = (x.reshape(-1, d_model) + pe[y.reshape(-1)]).reshape(seq, batch, d_model)
    assert out.shape == x.shape and out.dtype == x.dtype
    assert jnp.allclose(out, ref, atol=1e-5, rtol=1e-5)

    print("KERNEL_OK")
</pallas_src>

<mosaic_0001>
module attributes {stable_mosaic.version = 11 : i64} {
  func.func @_class_encoding_kernel(%arg0: i32, %arg1: memref<8x4xi32, #tpu.memory_space<vmem>>, %arg2: memref<8x128xf32, #tpu.memory_space<vmem>>, %arg3: memref<512x128xf32, #tpu.memory_space<vmem>>, %arg4: memref<8x128xf32, #tpu.memory_space<vmem>>) attributes {dimension_semantics = [#tpu.dimension_semantics<parallel>], iteration_bounds = array<i64: 1>, scalar_prefetch = 0 : i64, scratch_operands = 0 : i64, tpu.core_type = #tpu.core_type<tc>, window_params = [{transform_indices = @transform_0, window_bounds = array<i64: 8, 4>}, {transform_indices = @transform_1, window_bounds = array<i64: 8, 128>}, {pipeline_mode = #tpu.pipeline_mode<synchronous>, transform_indices = @transform_2, window_bounds = array<i64: 512, 128>}, {transform_indices = @transform_3, window_bounds = array<i64: 8, 128>}]} {
    %c0 = arith.constant 0 : index
    %c0_0 = arith.constant 0 : index
    %0 = vector.load %arg1[%c0, %c0_0] : memref<8x4xi32, #tpu.memory_space<vmem>>, vector<8x4xi32>
    %1 = tpu.iota {dimensions = array<i32: 1>} : vector<8x128xi32>
    %2 = vector.extract_strided_slice %0 {offsets = [0, 0], sizes = [8, 1], strides = [1, 1]} : vector<8x4xi32> to vector<8x1xi32>
    %3 = vector.broadcast %2 : vector<8x1xi32> to vector<8x128xi32>
    %4 = arith.cmpi eq, %3, %1 : vector<8x128xi32>
    %5 = arith.extui %4 : vector<8x128xi1> to vector<8x128xi32>
    %6 = arith.sitofp %5 : vector<8x128xi32> to vector<8x128xf32>
    %7 = vector.extract_strided_slice %0 {offsets = [0, 1], sizes = [8, 1], strides = [1, 1]} : vector<8x4xi32> to vector<8x1xi32>
    %8 = vector.broadcast %7 : vector<8x1xi32> to vector<8x128xi32>
    %9 = arith.cmpi eq, %8, %1 : vector<8x128xi32>
    %10 = arith.extui %9 : vector<8x128xi1> to vector<8x128xi32>
    %11 = arith.sitofp %10 : vector<8x128xi32> to vector<8x128xf32>
    %12 = vector.extract_strided_slice %0 {offsets = [0, 2], sizes = [8, 1], strides = [1, 1]} : vector<8x4xi32> to vector<8x1xi32>
    %13 = vector.broadcast %12 : vector<8x1xi32> to vector<8x128xi32>
    %14 = arith.cmpi eq, %13, %1 : vector<8x128xi32>
    %15 = arith.extui %14 : vector<8x128xi1> to vector<8x128xi32>
    %16 = arith.sitofp %15 : vector<8x128xi32> to vector<8x128xf32>
    %17 = vector.extract_strided_slice %0 {offsets = [0, 3], sizes = [8, 1], strides = [1, 1]} : vector<8x4xi32> to vector<8x1xi32>
    %18 = vector.broadcast %17 : vector<8x1xi32> to vector<8x128xi32>
    %19 = arith.cmpi eq, %18, %1 : vector<8x128xi32>
    %20 = arith.extui %19 : vector<8x128xi1> to vector<8x128xi32>
    %21 = arith.sitofp %20 : vector<8x128xi32> to vector<8x128xf32>
    %22 = tpu.concatenate %6, %11, %16, %21 in 1 : vector<8x128xf32>, vector<8x128xf32>, vector<8x128xf32>, vector<8x128xf32> -> vector<8x512xf32>
    %c0_1 = arith.constant 0 : index
    %c0_2 = arith.constant 0 : index
    %23 = vector.load %arg3[%c0_1, %c0_2] : memref<512x128xf32, #tpu.memory_space<vmem>>, vector<512x128xf32>
    %cst = arith.constant dense<0.000000e+00> : vector<8x128xf32>
    %24 = tpu.matmul %22, %23, %cst {dimension_numbers = #tpu.dot_dimension_numbers<[1], [0], [0], [1], [0, 0, 1, 1], [], []>} : vector<8x512xf32>, vector<512x128xf32>, vector<8x128xf32> -> vector<8x128xf32>
    %c0_3 = arith.constant 0 : index
    %c0_4 = arith.constant 0 : index
    %25 = vector.load %arg2[%c0_3, %c0_4] : memref<8x128xf32, #tpu.memory_space<vmem>>, vector<8x128xf32>
    %26 = arith.addf %25, %24 : vector<8x128xf32>
    %c0_5 = arith.constant 0 : index
    %c0_6 = arith.constant 0 : index
    %27 = vector.load %arg4[%c0_5, %c0_6] : memref<8x128xf32, #tpu.memory_space<vmem>>, vector<8x128xf32>
    tpu.vector_store %arg4[%c0_5, %c0_6], %26 {strides = array<i32>} : memref<8x128xf32, #tpu.memory_space<vmem>>, vector<8x128xf32>,
    return
  }
  func.func @transform_0(%arg0: i32) -> (i32, i32) {
    %c0_i32 = arith.constant 0 : i32
    %c0_i32_0 = arith.constant 0 : i32
    return %arg0, %c0_i32 : i32, i32
  }
  func.func @transform_1(%arg0: i32) -> (i32, i32) {
    %c0_i32 = arith.constant 0 : i32
    %c0_i32_0 = arith.constant 0 : i32
    return %arg0, %c0_i32 : i32, i32
  }
  func.func @transform_2(%arg0: i32) -> (i32, i32) {
    %c0_i32 = arith.constant 0 : i32
    %c0_i32_0 = arith.constant 0 : i32
    %c0_i32_1 = arith.constant 0 : i32
    return %c0_i32, %c0_i32_0 : i32, i32
  }
  func.func @transform_3(%arg0: i32) -> (i32, i32) {
    %c0_i32 = arith.constant 0 : i32
    %c0_i32_0 = arith.constant 0 : i32
    return %arg0, %c0_i32 : i32, i32
  }
}

</mosaic_0001>

<bundles_post_ra>
// kernel: tpu_custom_call.1
= control target key start
LH: loop header
LB: loop body
LE: loop exit
PB: predicated region body
PF: predicated region fallthrough
CT: control target
= control target key end

     0   :  { %8 = vsyncpa [#allocation3], 0  ;;  %s540_s0 = inlined_call_operand.vmem [shape: s32[8,4], index: 0, kind: input, shape index: {}]   ;;  %s541_s1 = inlined_call_operand.vmem [shape: f32[8,128], index: 1, kind: input, shape index: {}]   ;;  %s542_s2 = inlined_call_operand.hbm [shape: f32[512,128], index: 2, kind: input, shape index: {}]   ;;  %s543_s3 = inlined_call_operand.hbm [shape: f32[8,128], index: 3, kind: output, shape index: {}]  }
   0x1   :  { %9 = vsyncpa [#allocation4], 0  ;;  %s481_s12 = smov [#allocation2]   ;;  %s433_s16 = scalar_lea.hbm %s542_s2, 8192 }
   0x2   :  { %s19_s13 = sshll.u32 %s481_s12, 4  ;;  %p434_p0 = scmp.ne.s32.totalorder %s542_s2, %s433_s16  ;;  %s20_s13 = int_to_ptr.vmem [resolvable:$true] %s19_s13 }
   0x3   :  { %p437_p1 = scmp.lt.u32.totalorder %s433_s16, %s542_s2 }
   0x5   :  { %p439_p2 = pnand %p437_p1, %p434_p0 }
   0x7   :  { %442 = shalt.err (!%p439_p2)
}
   0x8   :  { %s443_s21 = scalar_lea.vmem %s20_s13, 8192  ;;  %p448_p4 = scmp.lt.s32.totalorder %s20_s13, %s20_s13 }
   0x9   :  { %p444_p3 = scmp.ne.s32.totalorder %s20_s13, %s443_s21  ;;  %p449_p5 = scmp.lt.s32.totalorder %s443_s21, %s443_s21 }
   0xb   :  { %p450_p6 = por %p449_p5, %p448_p4 }
   0xd   :  { %p451_p7 = pnand %p450_p6, %p444_p3 }
   0xf   :  { %454 = shalt.err (!%p451_p7)
}
  0x10   :  { %s482_s22 = smov 128   ;;  %s483_s23 = smov 8  }
  0x11   :  { %25 = dma.hbm_to_vmem [thread:$0]  %s542_s2, 8192, %s20_s13, [#allocation3], %s482_s22, %s482_s22, %s483_s23  }
  0x12   :  { %477 = dma.done.wait [#allocation3], 8192  }
  0x13   :  { %478 = vsyncadd [#allocation3], 4294959104  ;;  %v484_v0 = vmov 1   ;;  %v485_v1 = vmov 0   ;;  %v29_v2 = vld [vmem:[%s540_s0] sm:$0xff]  ;;  %v72_v3 = vld [vmem:[#allocation2 + $0x80] sm:$0xff] }
  0x14   :  { %429 = vset.pattern.permute.xlu0 %v484_v0  ;;  %431 = vset.pattern.permute.xlu1 %v485_v1  ;;  %v73_v4 = vld [vmem:[#allocation2 + $0x88] sm:$0xff]  ;;  %v56_v6 = vld [vmem:[#allocation2] sm:$0xff]  ;;  %v74_v8 = vld [vmem:[#allocation2 + $0x90] sm:$0xff]  ;;  %v486_v22 = vmov 3   ;;  %v487_v23 = vmov 2   ;;  %s489_s28 = smov [#allocation5]  }
  0x15   :  { %39 = vperm.xlu0 %429, %v29_v2   ;;  %33 = vperm.xlu1 %431, %v29_v2   ;;  %v356_v5 = vpack.c.bf16 %v73_v4, %v72_v3  ;;  %v57_v7 = vld [vmem:[#allocation2 + $0x8] sm:$0xff]  ;;  %v75_v10 = vld [vmem:[#allocation2 + $0x98] sm:$0xff]  ;;  %v58_v11 = vld [vmem:[#allocation2 + $0x10] sm:$0xff]  ;;  %s269_s29 = sshll.u32 %s489_s28, 4  ;;  %s270_s29 = int_to_ptr.vmem [resolvable:$true] %s269_s29 }
  0x16   :  { %v358_v9 = vpack.c.bf16 %v57_v7, %v56_v6  ;;  %v59_v12 = vld [vmem:[#allocation2 + $0x18] sm:$0xff]  ;;  %v360_v13 = vpack.c.bf16 %v75_v10, %v74_v8  ;;  %v104_v14 = vld [vmem:[#allocation2 + $0x180] sm:$0xff]  ;;  %v105_v15 = vld [vmem:[#allocation2 + $0x188] sm:$0xff]  ;;  %s455_s30 = scalar_lea.vmem %s270_s29, 128  ;;  %p460_p9 = scmp.lt.s32.totalorder %s270_s29, %s270_s29 }
  0x17   :  { %357 = vmatprep.subr.bf16.mxu0 %v356_v5  ;;  %v88_v16 = vld [vmem:[#allocation2 + $0x100] sm:$0xff]  ;;  %v362_v17 = vpack.c.bf16 %v59_v12, %v58_v11  ;;  %v388_v18 = vpack.c.bf16 %v105_v15, %v104_v14  ;;  %v89_v19 = vld [vmem:[#allocation2 + $0x108] sm:$0xff]  ;;  %v106_v28 = vld [vmem:[#allocation2 + $0x190] sm:$0xff]  ;;  %p456_p8 = scmp.ne.s32.totalorder %s270_s29, %s455_s30  ;;  %p461_p10 = scmp.lt.s32.totalorder %s455_s30, %s455_s30 }
  0x18   :  { %359 = vmatpush3.bf16.msra.mxu0 %v358_v9  ;;  %v76_v20 = vld [vmem:[#allocation2 + $0xa0] sm:$0xff]  ;;  %v77_v21 = vld [vmem:[#allocation2 + $0xa8] sm:$0xff]  ;;  %v390_v24 = vpack.c.bf16 %v89_v19, %v88_v16  ;;  %v107_v29 = vld [vmem:[#allocation2 + $0x198] sm:$0xff] }
  0x19   :  { %430 = vset.pattern.permute.xlu0 %v486_v22  ;;  %432 = vset.pattern.permute.xlu1 %v487_v23  ;;  %v364_v25 = vpack.c.bf16 %v77_v21, %v76_v20  ;;  %v60_v26 = vld [vmem:[#allocation2 + $0x20] sm:$0xff]  ;;  %v61_v27 = vld [vmem:[#allocation2 + $0x28] sm:$0xff]  ;;  %v90_v30 = vld [vmem:[#allocation2 + $0x110] sm:$0xff]  ;;  %v392_v32 = vpack.c.bf16 %v107_v29, %v106_v28  ;;  %p462_p11 = por %p461_p10, %p460_p9 }
  0x1a   :  { %51 = vperm.xlu0 %430, %v29_v2   ;;  %45 = vperm.xlu1 %432, %v29_v2   ;;  %v91_v31 = vld [vmem:[#allocation2 + $0x118] sm:$0xff]  ;;  %v78_v33 = vld [vmem:[#allocation2 + $0xb0] sm:$0xff]  ;;  %v366_v35 = vpack.c.bf16 %v61_v27, %v60_v26  ;;  %v108_v38 = vld [vmem:[#allocation2 + $0x1a0] sm:$0xff] }
  0x1b   :  { %361 = vmatprep.subr.bf16.mxu0 %v360_v13  ;;  %389 = vmatprep.subr.bf16.mxu1 %v388_v18  ;;  %v79_v34 = vld [vmem:[#allocation2 + $0xb8] sm:$0xff]  ;;  %v394_v36 = vpack.c.bf16 %v91_v31, %v90_v30  ;;  %v62_v37 = vld [vmem:[#allocation2 + $0x30] sm:$0xff]  ;;  %v109_v39 = vld [vmem:[#allocation2 + $0x1a8] sm:$0xff]  ;;  %p463_p12 = pnand %p462_p11, %p456_p8 }
  0x1c   :  { %363 = vmatpush3.bf16.msra.mxu0 %v362_v17  ;;  %391 = vmatpush3.bf16.msra.mxu1 %v390_v24  ;;  %v368_v40 = vpack.c.bf16 %v79_v34, %v78_v33  ;;  %v63_v41 = vld [vmem:[#allocation2 + $0x38] sm:$0xff]  ;;  %v396_v42 = vpack.c.bf16 %v109_v39, %v108_v38  ;;  %v92_v43 = vld [vmem:[#allocation2 + $0x120] sm:$0xff]  ;;  %v93_v44 = vld [vmem:[#allocation2 + $0x128] sm:$0xff] }
  0x1d   :  { %365 = vmatprep.subr.bf16.mxu0 %v364_v25  ;;  %393 = vmatprep.subr.bf16.mxu1 %v392_v32  ;;  %v80_v45 = vld [vmem:[#allocation2 + $0xc0] sm:$0xff]  ;;  %v81_v46 = vld [vmem:[#allocation2 + $0xc8] sm:$0xff]  ;;  %v110_v47 = vld [vmem:[#allocation2 + $0x1b0] sm:$0xff]  ;;  %v370_v49 = vpack.c.bf16 %v63_v41, %v62_v37  ;;  %v398_v50 = vpack.c.bf16 %v93_v44, %v92_v43  ;;  %v30_v37 = vlaneseq  ;;  %v488_v41 = vmov 1.0  }
  0x1e   :  { %v111_v48 = vld [vmem:[#allocation2 + $0x1b8] sm:$0xff]  ;;  %v64_v51 = vld [vmem:[#allocation2 + $0x40] sm:$0xff]  ;;  %v65_v52 = vld [vmem:[#allocation2 + $0x48] sm:$0xff]  ;;  %v372_v53 = vpack.c.bf16 %v81_v46, %v80_v45 }
  0x1f   :  { %v400_v54 = vpack.c.bf16 %v111_v48, %v110_v47  ;;  %v94_v55 = vld [vmem:[#allocation2 + $0x130] sm:$0xff]  ;;  %v95_v56 = vld [vmem:[#allocation2 + $0x138] sm:$0xff]  ;;  %v112_v59 = vld [vmem:[#allocation2 + $0x1c0] sm:$0xff]  ;;  %v374_v61 = vpack.c.bf16 %v65_v52, %v64_v51  ;;  %v31_v38 = vand.u32 127, %v30_v37 }
  0x20   :  { %367 = vmatpush3.bf16.msra.mxu0 %v366_v35  ;;  %395 = vmatpush3.bf16.msra.mxu1 %v394_v36  ;;  %v82_v57 = vld [vmem:[#allocation2 + $0xd0] sm:$0xff]  ;;  %v83_v58 = vld [vmem:[#allocation2 + $0xd8] sm:$0xff]  ;;  %v113_v60 = vld [vmem:[#allocation2 + $0x1c8] sm:$0xff]  ;;  %v402_v62 = vpack.c.bf16 %v95_v56, %v94_v55 }
  0x21   :  { %369 = vmatprep.subr.bf16.mxu0 %v368_v40  ;;  %397 = vmatprep.subr.bf16.mxu1 %v396_v42  ;;  %v66_v63 = vld [vmem:[#allocation2 + $0x50] sm:$0xff]  ;;  %v67_v0 = vld [vmem:[#allocation2 + $0x58] sm:$0xff]  ;;  %v376_v1 = vpack.c.bf16 %v83_v58, %v82_v57  ;;  %v404_v2 = vpack.c.bf16 %v113_v60, %v112_v59  ;;  %v96_v3 = vld [vmem:[#allocation2 + $0x140] sm:$0xff] }
  0x22   :  { %v97_v4 = vld [vmem:[#allocation2 + $0x148] sm:$0xff]  ;;  %v84_v5 = vld [vmem:[#allocation2 + $0xe0] sm:$0xff]  ;;  %v114_v7 = vld [vmem:[#allocation2 + $0x1d0] sm:$0xff]  ;;  %v378_v9 = vpack.c.bf16 %v67_v0, %v66_v63 }
  0x23   :  { %v85_v6 = vld [vmem:[#allocation2 + $0xe8] sm:$0xff]  ;;  %v115_v8 = vld [vmem:[#allocation2 + $0x1d8] sm:$0xff]  ;;  %v406_v10 = vpack.c.bf16 %v97_v4, %v96_v3  ;;  %v68_v11 = vld [vmem:[#allocation2 + $0x60] sm:$0xff] }
  0x24   :  { %371 = vmatpush3.bf16.msra.mxu0 %v370_v49  ;;  %399 = vmatpush3.bf16.msra.mxu1 %v398_v50  ;;  %v69_v12 = vld [vmem:[#allocation2 + $0x68] sm:$0xff]  ;;  %v380_v13 = vpack.c.bf16 %v85_v6, %v84_v5  ;;  %v408_v14 = vpack.c.bf16 %v115_v8, %v114_v7  ;;  %v98_v15 = vld [vmem:[#allocation2 + $0x150] sm:$0xff]  ;;  %v99_v16 = vld [vmem:[#allocation2 + $0x158] sm:$0xff] }
  0x25   :  { %373 = vmatprep.subr.bf16.mxu0 %v372_v53  ;;  %401 = vmatprep.subr.bf16.mxu1 %v400_v54  ;;  %v86_v17 = vld [vmem:[#allocation2 + $0xf0] sm:$0xff]  ;;  %v87_v18 = vld [vmem:[#allocation2 + $0xf8] sm:$0xff]  ;;  %v116_v19 = vld [vmem:[#allocation2 + $0x1e0] sm:$0xff]  ;;  %v382_v21 = vpack.c.bf16 %v69_v12, %v68_v11  ;;  %v410_v22 = vpack.c.bf16 %v99_v16, %v98_v15 }
  0x26   :  { %v117_v20 = vld [vmem:[#allocation2 + $0x1e8] sm:$0xff]  ;;  %v70_v23 = vld [vmem:[#allocation2 + $0x70] sm:$0xff]  ;;  %v384_v24 = vpack.c.bf16 %v87_v18, %v86_v17  ;;  %v71_v25 = vld [vmem:[#allocation2 + $0x78] sm:$0xff] }
  0x27   :  { %v412_v26 = vpack.c.bf16 %v117_v20, %v116_v19  ;;  %v100_v27 = vld [vmem:[#allocation2 + $0x160] sm:$0xff]  ;;  %v101_v28 = vld [vmem:[#allocation2 + $0x168] sm:$0xff]  ;;  %v118_v29 = vld [vmem:[#allocation2 + $0x1f0] sm:$0xff]  ;;  %v386_v31 = vpack.c.bf16 %v71_v25, %v70_v23 }
  0x28   :  { %375 = vmatpush3.bf16.msra.mxu0 %v374_v61  ;;  %403 = vmatpush3.bf16.msra.mxu1 %v402_v62  ;;  %v119_v30 = vld [vmem:[#allocation2 + $0x1f8] sm:$0xff]  ;;  %v414_v32 = vpack.c.bf16 %v101_v28, %v100_v27  ;;  %v102_v34 = vld [vmem:[#allocation2 + $0x170] sm:$0xff] }
  0x29   :  { %377 = vmatprep.subr.bf16.mxu0 %v376_v1  ;;  %405 = vmatprep.subr.bf16.mxu1 %v404_v2  ;;  %v416_v33 = vpack.c.bf16 %v119_v30, %v118_v29  ;;  %v103_v35 = vld [vmem:[#allocation2 + $0x178] sm:$0xff]  ;;  %v260_v50 = vld [vmem:[%s541_s1] sm:$0xff] }
  0x2a   :  { %v418_v36 = vpack.c.bf16 %v103_v35, %v102_v34 }
  0x2c   :  { %379 = vmatpush3.bf16.msra.mxu0 %v378_v9  ;;  %407 = vmatpush3.bf16.msra.mxu1 %v406_v10 }
  0x2d   :  { %381 = vmatprep.subr.bf16.mxu0 %v380_v13  ;;  %409 = vmatprep.subr.bf16.mxu1 %v408_v14 }
  0x30   :  { %383 = vmatpush3.bf16.msra.mxu0 %v382_v21  ;;  %411 = vmatpush3.bf16.msra.mxu1 %v410_v22 }
  0x31   :  { %385 = vmatprep.subr.bf16.mxu0 %v384_v24  ;;  %413 = vmatprep.subr.bf16.mxu1 %v412_v26 }
  0x34   :  { %387 = vmatpush3.bf16.msra.mxu0 %v386_v31  ;;  %415 = vmatpush3.bf16.msra.mxu1 %v414_v32 }
  0x35   :  { %417 = vmatprep.subr.bf16.mxu1 %v416_v33 }
  0x38   :  { %419 = vmatpush3.bf16.msra.mxu1 %v418_v36 }
  0x94   :  { %v40_v39 = vpop.permute.xlu0 %39  ;;  %v34_v40 = vpop.permute.xlu1 %33 }
  0x95   :  { %vm35_vm0 = vcmp.eq.s32.totalorder %v34_v40, %v31_v38  ;;  %vm41_vm1 = vcmp.eq.s32.totalorder %v40_v39, %v31_v38 }
  0x96   :  { %282 = vmatprep.mubr.msk.f32.mxu0 %vm41_vm1, %v488_v41 }
  0x97   :  { %283 = vmatmul.mubr.msk.f32.vlgmr.msra.gmra.mrb[0].mxu0 %vm35_vm0, %v488_v41 }
  0x99   :  { %v52_v42 = vpop.permute.xlu0 %51  ;;  %v46_v43 = vpop.permute.xlu1 %45 }
  0x9a   :  { %vm47_vm2 = vcmp.eq.s32.totalorder %v46_v43, %v31_v38  ;;  %vm53_vm3 = vcmp.eq.s32.totalorder %v52_v42, %v31_v38 }
  0x9b   :  { %284 = vmatprep.mubr.msk.f32.mxu1 %vm53_vm3, %v488_v41 }
  0x9c   :  { %285 = vmatmul.mubr.msk.f32.vlgmr.msra.gmra.mrb[0].mxu1 %vm47_vm2, %v488_v41 }
 0x16a   :  { %v318_v44 = vpop.f32.mrb[0].mxu0 }
 0x16b   :  { %v319_v45 = vpop.f32.mrb[1].mxu0 }
 0x16c   :  { %v320_v46 = vadd.f32 %v319_v45, %v318_v44 }
 0x16f   :  { %v353_v47 = vpop.f32.mrb[0].mxu1 }
 0x170   :  { %v354_v48 = vpop.f32.mrb[1].mxu1 }
 0x171   :  { %v355_v49 = vadd.f32 %v354_v48, %v353_v47 }
 0x173   :  { %v257_v51 = vadd.f32 %v355_v49, %v320_v46 }
 0x175   :  { %v261_v52 = vadd.f32 %v260_v50, %v257_v51 }
 0x177   :  { %262 = vst [vmem:[#allocation5] sm:$0xff] %v261_v52 }
 0x178   :  { %466 = shalt.err (!%p463_p12)
}
 0x179   :  { %s467_s6 = scalar_lea.hbm %s543_s3, 128 }
 0x17a   :  { %p468_p13 = scmp.ne.s32.totalorder %s543_s3, %s467_s6  ;;  %p471_p0 = scmp.lt.u32.totalorder %s467_s6, %s543_s3 }
 0x17c   :  { %p473_p1 = pnand %p471_p0, %p468_p13 }
 0x17e   :  { %476 = shalt.err (!%p473_p1)
}
 0x17f   :  { %272 = dma.vmem_to_hbm [thread:$0]  %s270_s29, 128, %s543_s3, [#allocation4]  }
 0x180   :  { %479 = dma.done.wait [#allocation4], 128  }
 0x181   :  { %480 = vsyncadd [#allocation4], 4294967168 }
 0x182   :  { %276 = vsyncpa [#allocation3], 1 }
 0x183   :  { %277 = vsyncpa [#allocation4], 1 }

</bundles_post_ra>
